<compile_context>
chip_gen: v5e
topology: v5e:2x2
jax: 0.10.0
libtpu: 0.0.40
codegen_flags: <defaults>
</compile_context>

<pallas_src>
import functools

import jax
import jax.numpy as jnp
from jax.experimental import pallas as pl
from jax.experimental.pallas import tpu as pltpu


OUT_LANES = 128  # lane-dense padded width of the final layer (real outputs = 2)
HIDDEN = 256


def _round_up(n, m):
    return ((n + m - 1) // m) * m


def softq_kernel(s_ref, a_ref, w1s_ref, w1a_ref, b1_ref,
                 w2_ref, b2_ref, w3p_ref, b3p_ref, o_ref):
    # Layer 1 with the concat fused: x @ W1 == state @ W1[:Ds] + action @ W1[Ds:]
    h1 = jnp.dot(s_ref[...], w1s_ref[...], preferred_element_type=jnp.float32)
    h1 = h1 + jnp.dot(a_ref[...], w1a_ref[...], preferred_element_type=jnp.float32)
    h1 = jnp.maximum(h1 + b1_ref[...], 0.0)                      # (tb, 256)

    # Layer 2
    h2 = jnp.dot(h1, w2_ref[...], preferred_element_type=jnp.float32)
    h2 = jnp.maximum(h2 + b2_ref[...], 0.0)                      # (tb, 256)

    # Layer 3 (lane-dense padded to 128 output columns; cols >= 2 are exact zeros)
    out = jnp.dot(h2, w3p_ref[...], preferred_element_type=jnp.float32)
    o_ref[...] = (out + b3p_ref[...]).astype(o_ref.dtype)        # (tb, 128)


def prepare_params(w1, b1, w2, b2, w3, b3, state_dim):
    """One-time param transform: split w1 for the fused concat, pad layer 3 to
    a lane-dense 128-wide output. Padding is exactly zero so extra lanes carry 0."""
    w1_s = w1[:state_dim]                     # (state_dim, 256)
    w1_a = w1[state_dim:]                     # (action_dim, 256)
    n_out = w3.shape[1]
    w3p = jnp.zeros((w3.shape[0], OUT_LANES), w3.dtype).at[:, :n_out].set(w3)
    b3p = jnp.zeros((1, OUT_LANES), b3.dtype).at[:, :n_out].set(b3)
    return w1_s, w1_a, b1, w2, b2, w3p, b3p


@functools.partial(jax.jit, static_argnames=("tile_b", "n_out"))
def softq_forward(state, action, w1_s, w1_a, b1, w2, b2, w3p, b3p,
                  tile_b=512, n_out=2):
    B, Ds = state.shape
    Da = action.shape[1]

    # Batch tile: sublane-aligned (multiple of 8), at most tile_b.
    tb = min(tile_b, _round_up(B, 8))
    B_pad = _round_up(B, tb)
    if B_pad != B:
        pad = B_pad - B
        state = jnp.pad(state, ((0, pad), (0, 0)))
        action = jnp.pad(action, ((0, pad), (0, 0)))

    grid = (B_pad // tb,)

    # Activations tiled over the batch; all weights use a constant index_map so
    # they are fetched once and stay resident in VMEM across grid steps.
    const = lambda i: (0, 0)
    in_specs = [
        pl.BlockSpec((tb, Ds), lambda i: (i, 0)),       # state tile
        pl.BlockSpec((tb, Da), lambda i: (i, 0)),       # action tile
        pl.BlockSpec(w1_s.shape, const),
        pl.BlockSpec(w1_a.shape, const),
        pl.BlockSpec(b1.shape, const),
        pl.BlockSpec(w2.shape, const),
        pl.BlockSpec(b2.shape, const),
        pl.BlockSpec(w3p.shape, const),
        pl.BlockSpec(b3p.shape, const),
    ]
    out_specs = pl.BlockSpec((tb, OUT_LANES), lambda i: (i, 0))

    # Advisory cost hint for the XLA scheduler.
    flops = 2 * B_pad * ((Ds + Da) * HIDDEN + HIDDEN * HIDDEN + HIDDEN * OUT_LANES)
    bytes_accessed = 4 * (
        B_pad * (Ds + Da + OUT_LANES)
        + (Ds + Da) * HIDDEN + HIDDEN * HIDDEN + HIDDEN * OUT_LANES
        + 2 * HIDDEN + OUT_LANES
    )
    cost = pl.CostEstimate(flops=flops, transcendentals=0,
                           bytes_accessed=bytes_accessed)

    out = pl.pallas_call(
        softq_kernel,
        out_shape=jax.ShapeDtypeStruct((B_pad, OUT_LANES), jnp.float32),
        grid=grid,
        in_specs=in_specs,
        out_specs=out_specs,
        compiler_params=pltpu.CompilerParams(
            dimension_semantics=("parallel",)),   # shards batch grid across TCs on v7x
        cost_estimate=cost,
    )(state, action, w1_s, w1_a, b1, w2, b2, w3p, b3p)

    return out[:B, :n_out]


def init_params(key, state_dim, action_dim, edge=0.003):
    """Deterministic synthetic init mirroring nn.Linear defaults + edge init."""
    in_dim = state_dim + action_dim
    k = jax.random.split(key, 6)

    def linear_init(kw, kb, fan_in, fan_out):
        bound = 1.0 / jnp.sqrt(fan_in)
        # stored as (in_features, out_features) so kernel computes x @ W
        w = jax.random.uniform(kw, (fan_in, fan_out), jnp.float32, -bound, bound)
        b = jax.random.uniform(kb, (1, fan_out), jnp.float32, -bound, bound)
        return w, b

    w1, b1 = linear_init(k[0], k[1], in_dim, HIDDEN)
    w2, b2 = linear_init(k[2], k[3], HIDDEN, HIDDEN)
    # linear3: uniform_(-edge, edge) for both weight and bias
    w3 = jax.random.uniform(k[4], (HIDDEN, 2), jnp.float32, -edge, edge)
    b3 = jax.random.uniform(k[5], (1, 2), jnp.float32, -edge, edge)
    return w1, b1, w2, b2, w3, b3


def reference_forward(state, action, w1, b1, w2, b2, w3, b3):
    x = jnp.concatenate([state, action], axis=1)
    x = jnp.maximum(x @ w1 + b1, 0.0)
    x = jnp.maximum(x @ w2 + b2, 0.0)
    return x @ w3 + b3


if __name__ == "__main__":
    key = jax.random.PRNGKey(0)
    k_params, k_state, k_action = jax.random.split(key, 3)

    state_dim = 24
    action_dim = 8

    raw_params = init_params(k_params, state_dim, action_dim, edge=0.003)
    prepped = prepare_params(*raw_params, state_dim=state_dim)

    # --- small RL-style batch ---
    batch = 8
    state = jax.random.normal(k_state, (batch, state_dim), jnp.float32)
    action = jax.random.normal(k_action, (batch, action_dim), jnp.float32)

    out = softq_forward(state, action, *prepped)
    out = jax.block_until_ready(out)
    ref = reference_forward(state, action, *raw_params)
    assert out.shape == (batch, 2), out.shape
    assert jnp.allclose(out, ref, atol=1e-5, rtol=1e-5), "mismatch vs JAX reference (B=8)"

    # --- training-sized batch to exercise the batch grid / pipelining ---
    batch2 = 512
    state2 = jax.random.normal(k_state, (batch2, state_dim), jnp.float32)
    action2 = jax.random.normal(k_action, (batch2, action_dim), jnp.float32)

    out2 = softq_forward(state2, action2, *prepped, tile_b=128)
    out2 = jax.block_until_ready(out2)
    ref2 = reference_forward(state2, action2, *raw_params)
    assert out2.shape == (batch2, 2), out2.shape
    assert jnp.allclose(out2, ref2, atol=1e-5, rtol=1e-5), "mismatch vs JAX reference (B=512)"

    print("KERNEL_OK")
</pallas_src>

<mosaic_0001>
module attributes {stable_mosaic.version = 11 : i64} {
  func.func @softq_kernel(%arg0: i32, %arg1: memref<8x24xf32, #tpu.memory_space<vmem>>, %arg2: memref<8x8xf32, #tpu.memory_space<vmem>>, %arg3: memref<24x256xf32, #tpu.memory_space<vmem>>, %arg4: memref<8x256xf32, #tpu.memory_space<vmem>>, %arg5: memref<1x256xf32, #tpu.memory_space<vmem>>, %arg6: memref<256x256xf32, #tpu.memory_space<vmem>>, %arg7: memref<1x256xf32, #tpu.memory_space<vmem>>, %arg8: memref<256x128xf32, #tpu.memory_space<vmem>>, %arg9: memref<1x128xf32, #tpu.memory_space<vmem>>, %arg10: memref<8x128xf32, #tpu.memory_space<vmem>>) attributes {dimension_semantics = [#tpu.dimension_semantics<parallel>], iteration_bounds = array<i64: 1>, scalar_prefetch = 0 : i64, scratch_operands = 0 : i64, tpu.core_type = #tpu.core_type<tc>, window_params = [{transform_indices = @transform_0, window_bounds = array<i64: 8, 24>}, {transform_indices = @transform_1, window_bounds = array<i64: 8, 8>}, {pipeline_mode = #tpu.pipeline_mode<synchronous>, transform_indices = @transform_2, window_bounds = array<i64: 24, 256>}, {pipeline_mode = #tpu.pipeline_mode<synchronous>, transform_indices = @transform_3, window_bounds = array<i64: 8, 256>}, {pipeline_mode = #tpu.pipeline_mode<synchronous>, transform_indices = @transform_4, window_bounds = array<i64: 1, 256>}, {pipeline_mode = #tpu.pipeline_mode<synchronous>, transform_indices = @transform_5, window_bounds = array<i64: 256, 256>}, {pipeline_mode = #tpu.pipeline_mode<synchronous>, transform_indices = @transform_6, window_bounds = array<i64: 1, 256>}, {pipeline_mode = #tpu.pipeline_mode<synchronous>, transform_indices = @transform_7, window_bounds = array<i64: 256, 128>}, {pipeline_mode = #tpu.pipeline_mode<synchronous>, transform_indices = @transform_8, window_bounds = array<i64: 1, 128>}, {transform_indices = @transform_9, window_bounds = array<i64: 8, 128>}]} {
    %c0 = arith.constant 0 : index
    %c0_0 = arith.constant 0 : index
    %0 = vector.load %arg1[%c0, %c0_0] : memref<8x24xf32, #tpu.memory_space<vmem>>, vector<8x24xf32>
    %c0_1 = arith.constant 0 : index
    %c0_2 = arith.constant 0 : index
    %1 = vector.load %arg3[%c0_1, %c0_2] : memref<24x256xf32, #tpu.memory_space<vmem>>, vector<24x256xf32>
    %cst = arith.constant dense<0.000000e+00> : vector<8x256xf32>
    %2 = tpu.matmul %0, %1, %cst {dimension_numbers = #tpu.dot_dimension_numbers<[1], [0], [0], [1], [0, 0, 1, 1], [], []>} : vector<8x24xf32>, vector<24x256xf32>, vector<8x256xf32> -> vector<8x256xf32>
    %c0_3 = arith.constant 0 : index
    %c0_4 = arith.constant 0 : index
    %3 = vector.load %arg2[%c0_3, %c0_4] : memref<8x8xf32, #tpu.memory_space<vmem>>, vector<8x8xf32>
    %c0_5 = arith.constant 0 : index
    %c0_6 = arith.constant 0 : index
    %4 = vector.load %arg4[%c0_5, %c0_6] : memref<8x256xf32, #tpu.memory_space<vmem>>, vector<8x256xf32>
    %cst_7 = arith.constant dense<0.000000e+00> : vector<8x256xf32>
    %5 = tpu.matmul %3, %4, %cst_7 {dimension_numbers = #tpu.dot_dimension_numbers<[1], [0], [0], [1], [0, 0, 1, 1], [], []>} : vector<8x8xf32>, vector<8x256xf32>, vector<8x256xf32> -> vector<8x256xf32>
    %6 = arith.addf %2, %5 : vector<8x256xf32>
    %c0_8 = arith.constant 0 : index
    %c0_9 = arith.constant 0 : index
    %7 = vector.load %arg5[%c0_8, %c0_9] : memref<1x256xf32, #tpu.memory_space<vmem>>, vector<1x256xf32>
    %8 = vector.broadcast %7 : vector<1x256xf32> to vector<8x256xf32>
    %9 = arith.addf %6, %8 : vector<8x256xf32>
    %cst_10 = arith.constant 0.000000e+00 : f32
    %10 = vector.broadcast %cst_10 : f32 to vector<8x256xf32>
    %11 = arith.maximumf %9, %10 : vector<8x256xf32>
    %c0_11 = arith.constant 0 : index
    %c0_12 = arith.constant 0 : index
    %12 = vector.load %arg6[%c0_11, %c0_12] : memref<256x256xf32, #tpu.memory_space<vmem>>, vector<256x256xf32>
    %cst_13 = arith.constant dense<0.000000e+00> : vector<8x256xf32>
    %13 = tpu.matmul %11, %12, %cst_13 {dimension_numbers = #tpu.dot_dimension_numbers<[1], [0], [0], [1], [0, 0, 1, 1], [], []>} : vector<8x256xf32>, vector<256x256xf32>, vector<8x256xf32> -> vector<8x256xf32>
    %c0_14 = arith.constant 0 : index
    %c0_15 = arith.constant 0 : index
    %14 = vector.load %arg7[%c0_14, %c0_15] : memref<1x256xf32, #tpu.memory_space<vmem>>, vector<1x256xf32>
    %15 = vector.broadcast %14 : vector<1x256xf32> to vector<8x256xf32>
    %16 = arith.addf %13, %15 : vector<8x256xf32>
    %cst_16 = arith.constant 0.000000e+00 : f32
    %17 = vector.broadcast %cst_16 : f32 to vector<8x256xf32>
    %18 = arith.maximumf %16, %17 : vector<8x256xf32>
    %c0_17 = arith.constant 0 : index
    %c0_18 = arith.constant 0 : index
    %19 = vector.load %arg8[%c0_17, %c0_18] : memref<256x128xf32, #tpu.memory_space<vmem>>, vector<256x128xf32>
    %cst_19 = arith.constant dense<0.000000e+00> : vector<8x128xf32>
    %20 = tpu.matmul %18, %19, %cst_19 {dimension_numbers = #tpu.dot_dimension_numbers<[1], [0], [0], [1], [0, 0, 1, 1], [], []>} : vector<8x256xf32>, vector<256x128xf32>, vector<8x128xf32> -> vector<8x128xf32>
    %c0_20 = arith.constant 0 : index
    %c0_21 = arith.constant 0 : index
    %21 = vector.load %arg9[%c0_20, %c0_21] : memref<1x128xf32, #tpu.memory_space<vmem>>, vector<1x128xf32>
    %22 = vector.broadcast %21 : vector<1x128xf32> to vector<8x128xf32>
    %23 = arith.addf %20, %22 : vector<8x128xf32>
    %c0_22 = arith.constant 0 : index
    %c0_23 = arith.constant 0 : index
    %24 = vector.load %arg10[%c0_22, %c0_23] : memref<8x128xf32, #tpu.memory_space<vmem>>, vector<8x128xf32>
    tpu.vector_store %arg10[%c0_22, %c0_23], %23 {strides = array<i32>} : memref<8x128xf32, #tpu.memory_space<vmem>>, vector<8x128xf32>,
    return
  }
  func.func @transform_0(%arg0: i32) -> (i32, i32) {
    %c0_i32 = arith.constant 0 : i32
    %c0_i32_0 = arith.constant 0 : i32
    return %arg0, %c0_i32 : i32, i32
  }
  func.func @transform_1(%arg0: i32) -> (i32, i32) {
    %c0_i32 = arith.constant 0 : i32
    %c0_i32_0 = arith.constant 0 : i32
    return %arg0, %c0_i32 : i32, i32
  }
  func.func @transform_2(%arg0: i32) -> (i32, i32) {
    %c0_i32 = arith.constant 0 : i32
    %c0_i32_0 = arith.constant 0 : i32
    %c0_i32_1 = arith.constant 0 : i32
    return %c0_i32, %c0_i32_0 : i32, i32
  }
  func.func @transform_3(%arg0: i32) -> (i32, i32) {
    %c0_i32 = arith.constant 0 : i32
    %c0_i32_0 = arith.constant 0 : i32
    %c0_i32_1 = arith.constant 0 : i32
    return %c0_i32, %c0_i32_0 : i32, i32
  }
  func.func @transform_4(%arg0: i32) -> (i32, i32) {
    %c0_i32 = arith.constant 0 : i32
    %c0_i32_0 = arith.constant 0 : i32
    %c0_i32_1 = arith.constant 0 : i32
    return %c0_i32, %c0_i32_0 : i32, i32
  }
  func.func @transform_5(%arg0: i32) -> (i32, i32) {
    %c0_i32 = arith.constant 0 : i32
    %c0_i32_0 = arith.constant 0 : i32
    %c0_i32_1 = arith.constant 0 : i32
    return %c0_i32, %c0_i32_0 : i32, i32
  }
  func.func @transform_6(%arg0: i32) -> (i32, i32) {
    %c0_i32 = arith.constant 0 : i32
    %c0_i32_0 = arith.constant 0 : i32
    %c0_i32_1 = arith.constant 0 : i32
    return %c0_i32, %c0_i32_0 : i32, i32
  }
  func.func @transform_7(%arg0: i32) -> (i32, i32) {
    %c0_i32 = arith.constant 0 : i32
    %c0_i32_0 = arith.constant 0 : i32
    %c0_i32_1 = arith.constant 0 : i32
    return %c0_i32, %c0_i32_0 : i32, i32
  }
  func.func @transform_8(%arg0: i32) -> (i32, i32) {
    %c0_i32 = arith.constant 0 : i32
    %c0_i32_0 = arith.constant 0 : i32
    %c0_i32_1 = arith.constant 0 : i32
    return %c0_i32, %c0_i32_0 : i32, i32
  }
  func.func @transform_9(%arg0: i32) -> (i32, i32) {
    %c0_i32 = arith.constant 0 : i32
    %c0_i32_0 = arith.constant 0 : i32
    return %arg0, %c0_i32 : i32, i32
  }
}

</mosaic_0001>

<bundles_post_ra>
// kernel: softq_forward.1
= control target key start
LH: loop header
LB: loop body
LE: loop exit
PB: predicated region body
PF: predicated region fallthrough
CT: control target
= control target key end

     0   :  { %14 = vsyncpa [#allocation3], 0  ;;  %s722_s0 = inlined_call_operand.hbm [shape: f32[8,24], index: 0, kind: input, shape index: {}]   ;;  %s723_s1 = inlined_call_operand.hbm [shape: f32[8,8], index: 1, kind: input, shape index: {}]   ;;  %s724_s2 = inlined_call_operand.hbm [shape: f32[24,256], index: 2, kind: input, shape index: {}]   ;;  %s725_s3 = inlined_call_operand.hbm [shape: f32[8,256], index: 3, kind: input, shape index: {}]   ;;  %s726_s4 = inlined_call_operand.vmem [shape: f32[1,256], index: 4, kind: input, shape index: {}]   ;;  %s727_s5 = inlined_call_operand.hbm [shape: f32[256,256], index: 5, kind: input, shape index: {}]   ;;  %s728_s6 = inlined_call_operand.vmem [shape: f32[1,256], index: 6, kind: input, shape index: {}]   ;;  %s729_s7 = inlined_call_operand.hbm [shape: f32[256,128], index: 7, kind: input, shape index: {}]   ;;  %s730_s8 = inlined_call_operand.vmem [shape: f32[1,128], index: 8, kind: input, shape index: {}]   ;;  %s731_s9 = inlined_call_operand.vmem [shape: f32[8,128], index: 9, kind: output, shape index: {}]  }
   0x1   :  { %15 = vsyncpa [#allocation5], 0 }
   0x2   :  { %16 = vsyncpa [#allocation8], 0  ;;  %s34_s11 = sshll.u32 %s723_s1, 4  ;;  %s35_s11 = int_to_ptr.hbm [resolvable:$true] %s34_s11 }
   0x3   :  { %17 = vsyncpa [#allocation11], 0  ;;  %s632_s12 = smov [#allocation4]   ;;  %s58_s16 = sshll.u32 %s725_s3, 4  ;;  %s59_s16 = int_to_ptr.hbm [resolvable:$true] %s58_s16 }
   0x4   :  { %s36_s13 = sshll.u32 %s632_s12, 4  ;;  %s633_s17 = smov [#allocation7]   ;;  %s37_s13 = int_to_ptr.vmem [resolvable:$true] %s36_s13 }
   0x5   :  { %39 = dma.hbm_to_vmem [thread:$0]  %s35_s11, 128, %s37_s13, [#allocation5]  }
   0x6   :  { %s60_s18 = sshll.u32 %s633_s17, 4  ;;  %s23_s21 = sshll.u32 %s722_s0, 4  ;;  %s61_s18 = int_to_ptr.vmem [resolvable:$true] %s60_s18  ;;  %s24_s21 = int_to_ptr.hbm [resolvable:$true] %s23_s21 }
   0x7   :  { %63 = dma.hbm_to_vmem [thread:$0]  %s59_s16, 256, %s61_s18, [#allocation8]  }
   0x8   :  { %s44_s23 = sshll.u32 %s724_s2, 4  ;;  %s634_s24 = smov [#allocation2]   ;;  %s45_s23 = int_to_ptr.hbm [resolvable:$true] %s44_s23 }
   0x9   :  { %s25_s25 = sshll.u32 %s634_s24, 4  ;;  %s635_s3 = smov [#allocation6]   ;;  %s26_s25 = int_to_ptr.vmem [resolvable:$true] %s25_s25 }
   0xa   :  { %28 = dma.hbm_to_vmem [thread:$0]  %s24_s21, 128, %s26_s25, [#allocation3]  }
   0xb   :  { %s46_s26 = sshll.u32 %s635_s3, 4  ;;  %s636_s27 = smov 256   ;;  %s47_s26 = int_to_ptr.vmem [resolvable:$true] %s46_s26 }
   0xc   :  { %s637_s28 = smov 16   ;;  %s70_s30 = sshll.u32 %s727_s5, 4  ;;  %s71_s30 = int_to_ptr.hbm [resolvable:$true] %s70_s30 }
   0xd   :  { %52 = dma.hbm_to_vmem [thread:$0]  %s45_s23, 768, %s47_s26, [#allocation5], %s636_s27, %s636_s27, %s637_s28  }
   0xe   :  { %s638_s10 = smov [#allocation9]   ;;  %s85_s13 = sshll.u32 %s729_s7, 4  ;;  %s86_s13 = int_to_ptr.hbm [resolvable:$true] %s85_s13 }
   0xf   :  { %s72_s11 = sshll.u32 %s638_s10, 4  ;;  %s639_s14 = smov [#allocation10]   ;;  %s73_s11 = int_to_ptr.vmem [resolvable:$true] %s72_s11 }
  0x10   :  { %78 = dma.hbm_to_vmem [thread:$0]  %s71_s30, 8192, %s73_s11, [#allocation8], %s636_s27, %s636_s27, %s637_s28  }
  0x11   :  { %s87_s15 = sshll.u32 %s639_s14, 4  ;;  %s640_s16 = smov 128   ;;  %s88_s15 = int_to_ptr.vmem [resolvable:$true] %s87_s15 }
  0x12   :  { %s641_s17 = smov 8  }
  0x13   :  { %93 = dma.hbm_to_vmem [thread:$0]  %s86_s13, 4096, %s88_s15, [#allocation11], %s640_s16, %s640_s16, %s641_s17  }
  0x14   :  { %624 = dma.done.wait [#allocation3], 128  }
  0x15   :  { %625 = vsyncadd [#allocation3], 4294967168 }
  0x16   :  { %626 = dma.done.wait [#allocation5], 896  }
  0x17   :  { %627 = vsyncadd [#allocation5], 4294966400 }
  0x18   :  { %628 = dma.done.wait [#allocation8], 8448  }
  0x19   :  { %629 = vsyncadd [#allocation8], 4294958848 }
  0x1a   :  { %630 = dma.done.wait [#allocation11], 4096  }
  0x1b   :  { %631 = vsyncadd [#allocation11], 4294963200  ;;  %vm130_vm0 = vcmask 64512   ;;  %v128_v0 = vld [vmem:[#allocation7] sm:$0xff]  ;;  %v129_v1 = vld [vmem:[#allocation7 + $0x8] sm:$0xff]  ;;  %vm174_vm1 = vcmask 195584  }
  0x1c   :  { %v127_v2 = vld [vmem:[#allocation4] sm:$0xff]  ;;  %149 = vmatpush.msra.mxu2 %v128_v0  ;;  %169 = vmatpush.msra.mxu3 %v129_v1  ;;  %v125_v3 = vld [vmem:[#allocation6 + $0x20] sm:$0xff]  ;;  %v126_v4 = vld [vmem:[#allocation6 + $0x28] sm:$0xff] }
  0x1d   :  { %465 = vmatmul.msk.f32.vlgmr.msra.gmra.mxu2 %vm130_vm0, %v127_v2  ;;  %466 = vmatmul.msk.f32.vlgmr.msra.gmra.mxu3 %vm130_vm0, %v127_v2  ;;  %v123_v5 = vld [vmem:[#allocation6 + $0x10] sm:$0xff]  ;;  %v124_v6 = vld [vmem:[#allocation6 + $0x18] sm:$0xff]  ;;  %v121_v9 = vld [vmem:[#allocation6] sm:$0xff] }
  0x1e   :  { %191 = vmatpush.msrb.mxu2 %v125_v3  ;;  %211 = vmatpush.msrb.mxu3 %v126_v4  ;;  %v258_v7 = vld [vmem:[#allocation9 + $0xf0] sm:$0xff]  ;;  %v122_v10 = vld [vmem:[#allocation6 + $0x8] sm:$0xff]  ;;  %v256_v11 = vld [vmem:[#allocation9 + $0xe0] sm:$0xff] }
  0x1f   :  { %v290_v8 = vld [vmem:[#allocation9 + $0x1f0] sm:$0xff]  ;;  %298 = vmatpush.msra.mxu0 %v258_v7  ;;  %v259_v12 = vld [vmem:[#allocation9 + $0xf8] sm:$0xff]  ;;  %v288_v14 = vld [vmem:[#allocation9 + $0x1e0] sm:$0xff] }
  0x20   :  { %318 = vmatpush.msra.mxu1 %v290_v8  ;;  %192 = vmatpush.msrb.mxu2 %v123_v5  ;;  %v291_v13 = vld [vmem:[#allocation9 + $0x1f8] sm:$0xff]  ;;  %v254_v15 = vld [vmem:[#allocation9 + $0xd0] sm:$0xff]  ;;  %v257_v18 = vld [vmem:[#allocation9 + $0xe8] sm:$0xff] }
  0x21   :  { %212 = vmatpush.msrb.mxu3 %v124_v6  ;;  %299 = vmatpush.msra.mxu0 %v256_v11  ;;  %v286_v16 = vld [vmem:[#allocation9 + $0x1d0] sm:$0xff]  ;;  %v289_v19 = vld [vmem:[#allocation9 + $0x1e8] sm:$0xff]  ;;  %v252_v20 = vld [vmem:[#allocation9 + $0xc0] sm:$0xff] }
  0x22   :  { %319 = vmatpush.msra.mxu1 %v288_v14  ;;  %193 = vmatpush.msrb.mxu2 %v121_v9  ;;  %v120_v17 = vld [vmem:[#allocation2] sm:$0xff]  ;;  %v284_v21 = vld [vmem:[#allocation9 + $0x1c0] sm:$0xff]  ;;  %v255_v22 = vld [vmem:[#allocation9 + $0xd8] sm:$0xff] }
  0x23   :  { %213 = vmatpush.msrb.mxu3 %v122_v10  ;;  %300 = vmatpush.msra.mxu0 %v254_v15  ;;  %v287_v23 = vld [vmem:[#allocation9 + $0x1d8] sm:$0xff]  ;;  %v250_v24 = vld [vmem:[#allocation9 + $0xb0] sm:$0xff]  ;;  %v253_v26 = vld [vmem:[#allocation9 + $0xc8] sm:$0xff] }
  0x24   :  { %338 = vmatpush.msra.mxu2 %v259_v12  ;;  %320 = vmatpush.msra.mxu1 %v286_v16  ;;  %v282_v25 = vld [vmem:[#allocation9 + $0x1b0] sm:$0xff]  ;;  %v285_v27 = vld [vmem:[#allocation9 + $0x1c8] sm:$0xff]  ;;  %v248_v28 = vld [vmem:[#allocation9 + $0xa0] sm:$0xff] }
  0x25   :  { %358 = vmatpush.msra.mxu3 %v291_v13  ;;  %467 = vmatmul.msk.f32.vlgmr.msrb.gmra.mxu2 %vm174_vm1, %v120_v17  ;;  %v280_v29 = vld [vmem:[#allocation9 + $0x1a0] sm:$0xff]  ;;  %v251_v30 = vld [vmem:[#allocation9 + $0xb8] sm:$0xff]  ;;  %v246_v32 = vld [vmem:[#allocation9 + $0x90] sm:$0xff] }
  0x26   :  { %468 = vmatmul.msk.f32.vlgmr.msrb.gmra.mxu3 %vm174_vm1, %v120_v17  ;;  %339 = vmatpush.msra.mxu2 %v257_v18  ;;  %v283_v31 = vld [vmem:[#allocation9 + $0x1b8] sm:$0xff]  ;;  %v278_v33 = vld [vmem:[#allocation9 + $0x190] sm:$0xff]  ;;  %v249_v34 = vld [vmem:[#allocation9 + $0xa8] sm:$0xff] }
  0x27   :  { %359 = vmatpush.msra.mxu3 %v289_v19  ;;  %301 = vmatpush.msra.mxu0 %v252_v20  ;;  %v281_v35 = vld [vmem:[#allocation9 + $0x1a8] sm:$0xff]  ;;  %v244_v36 = vld [vmem:[#allocation9 + $0x80] sm:$0xff]  ;;  %v247_v38 = vld [vmem:[#allocation9 + $0x98] sm:$0xff] }
  0x28   :  { %321 = vmatpush.msra.mxu1 %v284_v21  ;;  %340 = vmatpush.msra.mxu2 %v255_v22  ;;  %v276_v37 = vld [vmem:[#allocation9 + $0x180] sm:$0xff]  ;;  %v279_v39 = vld [vmem:[#allocation9 + $0x198] sm:$0xff]  ;;  %v245_v40 = vld [vmem:[#allocation9 + $0x88] sm:$0xff] }
  0x29   :  { %360 = vmatpush.msra.mxu3 %v287_v23  ;;  %302 = vmatpush.msra.mxu0 %v250_v24  ;;  %v277_v41 = vld [vmem:[#allocation9 + $0x188] sm:$0xff]  ;;  %v242_v42 = vld [vmem:[#allocation9 + $0x70] sm:$0xff]  ;;  %v243_v44 = vld [vmem:[#allocation9 + $0x78] sm:$0xff] }
  0x2a   :  { %322 = vmatpush.msra.mxu1 %v282_v25  ;;  %341 = vmatpush.msra.mxu2 %v253_v26  ;;  %v274_v43 = vld [vmem:[#allocation9 + $0x170] sm:$0xff]  ;;  %v275_v45 = vld [vmem:[#allocation9 + $0x178] sm:$0xff]  ;;  %v240_v46 = vld [vmem:[#allocation9 + $0x60] sm:$0xff] }
  0x2b   :  { %361 = vmatpush.msra.mxu3 %v285_v27  ;;  %303 = vmatpush.msra.mxu0 %v248_v28  ;;  %v272_v47 = vld [vmem:[#allocation9 + $0x160] sm:$0xff]  ;;  %v241_v48 = vld [vmem:[#allocation9 + $0x68] sm:$0xff]  ;;  %v238_v50 = vld [vmem:[#allocation9 + $0x50] sm:$0xff] }
  0x2c   :  { %323 = vmatpush.msra.mxu1 %v280_v29  ;;  %342 = vmatpush.msra.mxu2 %v251_v30  ;;  %v273_v49 = vld [vmem:[#allocation9 + $0x168] sm:$0xff]  ;;  %v270_v51 = vld [vmem:[#allocation9 + $0x150] sm:$0xff]  ;;  %v239_v52 = vld [vmem:[#allocation9 + $0x58] sm:$0xff] }
  0x2d   :  { %362 = vmatpush.msra.mxu3 %v283_v31  ;;  %304 = vmatpush.msra.mxu0 %v246_v32  ;;  %v271_v53 = vld [vmem:[#allocation9 + $0x158] sm:$0xff]  ;;  %v236_v54 = vld [vmem:[#allocation9 + $0x40] sm:$0xff]  ;;  %v237_v56 = vld [vmem:[#allocation9 + $0x48] sm:$0xff] }
  0x2e   :  { %324 = vmatpush.msra.mxu1 %v278_v33  ;;  %343 = vmatpush.msra.mxu2 %v249_v34  ;;  %v268_v55 = vld [vmem:[#allocation9 + $0x140] sm:$0xff]  ;;  %v269_v57 = vld [vmem:[#allocation9 + $0x148] sm:$0xff]  ;;  %v234_v58 = vld [vmem:[#allocation9 + $0x30] sm:$0xff] }
  0x2f   :  { %363 = vmatpush.msra.mxu3 %v281_v35  ;;  %305 = vmatpush.msra.mxu0 %v244_v36  ;;  %v266_v59 = vld [vmem:[#allocation9 + $0x130] sm:$0xff]  ;;  %v235_v60 = vld [vmem:[#allocation9 + $0x38] sm:$0xff]  ;;  %v232_v62 = vld [vmem:[#allocation9 + $0x20] sm:$0xff] }
  0x30   :  { %325 = vmatpush.msra.mxu1 %v276_v37  ;;  %344 = vmatpush.msra.mxu2 %v247_v38  ;;  %v267_v61 = vld [vmem:[#allocation9 + $0x138] sm:$0xff]  ;;  %v264_v63 = vld [vmem:[#allocation9 + $0x120] sm:$0xff]  ;;  %v233_v0 = vld [vmem:[#allocation9 + $0x28] sm:$0xff] }
  0x31   :  { %364 = vmatpush.msra.mxu3 %v279_v39  ;;  %306 = vmatpush.msra.mxu0 %v242_v42  ;;  %v265_v1 = vld [vmem:[#allocation9 + $0x128] sm:$0xff]  ;;  %v230_v2 = vld [vmem:[#allocation9 + $0x10] sm:$0xff]  ;;  %v231_v4 = vld [vmem:[#allocation9 + $0x18] sm:$0xff] }
  0x32   :  { %345 = vmatpush.msra.mxu2 %v245_v40  ;;  %326 = vmatpush.msra.mxu1 %v274_v43  ;;  %v262_v3 = vld [vmem:[#allocation9 + $0x110] sm:$0xff]  ;;  %v263_v5 = vld [vmem:[#allocation9 + $0x118] sm:$0xff]  ;;  %v228_v6 = vld [vmem:[#allocation9] sm:$0xff] }
  0x33   :  { %365 = vmatpush.msra.mxu3 %v277_v41  ;;  %307 = vmatpush.msra.mxu0 %v240_v46  ;;  %v260_v7 = vld [vmem:[#allocation9 + $0x100] sm:$0xff]  ;;  %v229_v8 = vld [vmem:[#allocation9 + $0x8] sm:$0xff]  ;;  %v395_v10 = vld [vmem:[#allocation10 + $0x78] sm:$0xff] }
  0x34   :  { %346 = vmatpush.msra.mxu2 %v243_v44  ;;  %327 = vmatpush.msra.mxu1 %v272_v47  ;;  %v261_v9 = vld [vmem:[#allocation9 + $0x108] sm:$0xff]  ;;  %v394_v11 = vld [vmem:[#allocation10 + $0x70] sm:$0xff]  ;;  %v411_v12 = vld [vmem:[#allocation10 + $0xf8] sm:$0xff] }
  0x35   :  { %366 = vmatpush.msra.mxu3 %v275_v45  ;;  %308 = vmatpush.msra.mxu0 %v238_v50  ;;  %v393_v13 = vld [vmem:[#allocation10 + $0x68] sm:$0xff]  ;;  %v410_v14 = vld [vmem:[#allocation10 + $0xf0] sm:$0xff]  ;;  %v392_v16 = vld [vmem:[#allocation10 + $0x60] sm:$0xff] }
  0x36   :  { %347 = vmatpush.msra.mxu2 %v241_v48  ;;  %328 = vmatpush.msra.mxu1 %v270_v51  ;;  %v409_v15 = vld [vmem:[#allocation10 + $0xe8] sm:$0xff]  ;;  %v408_v17 = vld [vmem:[#allocation10 + $0xe0] sm:$0xff]  ;;  %v391_v18 = vld [vmem:[#allocation10 + $0x58] sm:$0xff] }
  0x37   :  { %367 = vmatpush.msra.mxu3 %v273_v49  ;;  %309 = vmatpush.msra.mxu0 %v236_v54  ;;  %v407_v19 = vld [vmem:[#allocation10 + $0xd8] sm:$0xff]  ;;  %v390_v20 = vld [vmem:[#allocation10 + $0x50] sm:$0xff]  ;;  %v389_v22 = vld [vmem:[#allocation10 + $0x48] sm:$0xff] }
  0x38   :  { %348 = vmatpush.msra.mxu2 %v239_v52  ;;  %329 = vmatpush.msra.mxu1 %v268_v55  ;;  %v406_v21 = vld [vmem:[#allocation10 + $0xd0] sm:$0xff]  ;;  %v405_v23 = vld [vmem:[#allocation10 + $0xc8] sm:$0xff]  ;;  %v388_v24 = vld [vmem:[#allocation10 + $0x40] sm:$0xff] }
  0x39   :  { %368 = vmatpush.msra.mxu3 %v271_v53  ;;  %310 = vmatpush.msra.mxu0 %v234_v58  ;;  %v404_v25 = vld [vmem:[#allocation10 + $0xc0] sm:$0xff]  ;;  %v387_v26 = vld [vmem:[#allocation10 + $0x38] sm:$0xff]  ;;  %v386_v30 = vld [vmem:[#allocation10 + $0x30] sm:$0xff] }
  0x3a   :  { %349 = vmatpush.msra.mxu2 %v237_v56  ;;  %330 = vmatpush.msra.mxu1 %v266_v59  ;;  %v403_v27 = vld [vmem:[#allocation10 + $0xb8] sm:$0xff]  ;;  %v385_v31 = vld [vmem:[#allocation10 + $0x28] sm:$0xff]  ;;  %v218_v32 = vld [vmem:[%s726_s4] sm:$0x3] }
  0x3b   :  { %369 = vmatpush.msra.mxu3 %v269_v57  ;;  %311 = vmatpush.msra.mxu0 %v232_v62  ;;  %v384_v33 = vld [vmem:[#allocation10 + $0x20] sm:$0xff]  ;;  %v220_v34 = vperm.slane %v218_v32, 0  ;;  %v221_v35 = vperm.slane %v218_v32, 1  ;;  %v383_v44 = vld [vmem:[#allocation10 + $0x18] sm:$0xff]  ;;  %v402_v45 = vld [vmem:[#allocation10 + $0xb0] sm:$0xff] }
  0x3c   :  { %350 = vmatpush.msra.mxu2 %v235_v60  ;;  %331 = vmatpush.msra.mxu1 %v264_v63  ;;  %v382_v46 = vld [vmem:[#allocation10 + $0x10] sm:$0xff]  ;;  %v401_v47 = vld [vmem:[#allocation10 + $0xa8] sm:$0xff]  ;;  %v400_v49 = vld [vmem:[#allocation10 + $0xa0] sm:$0xff] }
  0x3d   :  { %370 = vmatpush.msra.mxu3 %v267_v61  ;;  %312 = vmatpush.msra.mxu0 %v230_v2  ;;  %v381_v48 = vld [vmem:[#allocation10 + $0x8] sm:$0xff]  ;;  %v380_v50 = vld [vmem:[#allocation10] sm:$0xff]  ;;  %v399_v51 = vld [vmem:[#allocation10 + $0x98] sm:$0xff] }
  0x3e   :  { %351 = vmatpush.msra.mxu2 %v233_v0  ;;  %332 = vmatpush.msra.mxu1 %v262_v3  ;;  %v398_v52 = vld [vmem:[#allocation10 + $0x90] sm:$0xff]  ;;  %v397_v53 = vld [vmem:[#allocation10 + $0x88] sm:$0xff]  ;;  %v396_v54 = vld [vmem:[#allocation10 + $0x80] sm:$0xff] }
  0x3f   :  { %371 = vmatpush.msra.mxu3 %v265_v1  ;;  %313 = vmatpush.msra.mxu0 %v228_v6  ;;  %v292_v55 = vld [vmem:[%s728_s6] sm:$0x3] }
  0x40   :  { %352 = vmatpush.msra.mxu2 %v231_v4  ;;  %333 = vmatpush.msra.mxu1 %v260_v7  ;;  %v294_v56 = vperm.slane %v292_v55, 0  ;;  %v295_v61 = vperm.slane %v292_v55, 1  ;;  %v479_v4 = vld [vmem:[%s730_s8] ss:$0 sm:$0xff] }
  0x41   :  { %372 = vmatpush.msra.mxu3 %v263_v5  ;;  %416 = vmatpush.msrb.mxu0 %v395_v10 }
  0x42   :  { %353 = vmatpush.msra.mxu2 %v229_v8  ;;  %436 = vmatpush.msrb.mxu1 %v411_v12 }
  0x43   :  { %373 = vmatpush.msra.mxu3 %v261_v9  ;;  %417 = vmatpush.msrb.mxu0 %v394_v11 }
  0x44   :  { %437 = vmatpush.msrb.mxu1 %v410_v14 }
  0x45   :  { %418 = vmatpush.msrb.mxu0 %v393_v13 }
  0x46   :  { %438 = vmatpush.msrb.mxu1 %v409_v15 }
  0x47   :  { %419 = vmatpush.msrb.mxu0 %v392_v16 }
  0x48   :  { %439 = vmatpush.msrb.mxu1 %v408_v17 }
  0x49   :  { %420 = vmatpush.msrb.mxu0 %v391_v18 }
  0x4a   :  { %440 = vmatpush.msrb.mxu1 %v407_v19 }
  0x4b   :  { %421 = vmatpush.msrb.mxu0 %v390_v20 }
  0x4c   :  { %441 = vmatpush.msrb.mxu1 %v406_v21 }
  0x4d   :  { %422 = vmatpush.msrb.mxu0 %v389_v22 }
  0x4e   :  { %442 = vmatpush.msrb.mxu1 %v405_v23 }
  0x4f   :  { %423 = vmatpush.msrb.mxu0 %v388_v24 }
  0x50   :  { %443 = vmatpush.msrb.mxu1 %v404_v25 }
  0x51   :  { %424 = vmatpush.msrb.mxu0 %v387_v26 }
  0x52   :  { %444 = vmatpush.msrb.mxu1 %v403_v27 }
  0x53   :  { %425 = vmatpush.msrb.mxu0 %v386_v30 }
  0x54   :  { %445 = vmatpush.msrb.mxu1 %v402_v45 }
  0x55   :  { %426 = vmatpush.msrb.mxu0 %v385_v31 }
  0x56   :  { %446 = vmatpush.msrb.mxu1 %v401_v47 }
  0x57   :  { %427 = vmatpush.msrb.mxu0 %v384_v33 }
  0x58   :  { %447 = vmatpush.msrb.mxu1 %v400_v49 }
  0x59   :  { %428 = vmatpush.msrb.mxu0 %v383_v44 }
  0x5a   :  { %448 = vmatpush.msrb.mxu1 %v399_v51 }
  0x5b   :  { %429 = vmatpush.msrb.mxu0 %v382_v46 }
  0x5c   :  { %449 = vmatpush.msrb.mxu1 %v398_v52 }
  0x5d   :  { %430 = vmatpush.msrb.mxu0 %v381_v48 }
  0x5e   :  { %450 = vmatpush.msrb.mxu1 %v397_v53 }
  0x5f   :  { %431 = vmatpush.msrb.mxu0 %v380_v50 }
  0x60   :  { %451 = vmatpush.msrb.mxu1 %v396_v54 }
  0xa0   :  { %v151_v28 = vpop.f32.mrf.mxu2  ;;  %v171_v29 = vpop.f32.mrf.mxu3 }
  0xa8   :  { %v195_v36 = vpop.f32.mrf.mxu2 }
  0xa9   :  { %v215_v37 = vpop.f32.mrf.mxu3  ;;  %v196_v38 = vadd.f32 %v195_v36, %v151_v28 }
  0xaa   :  { %v216_v39 = vadd.f32 %v215_v37, %v171_v29 }
  0xab   :  { %v224_v40 = vadd.f32 %v220_v34, %v196_v38 }
  0xac   :  { %v225_v41 = vadd.f32 %v221_v35, %v216_v39 }
  0xad   :  { %v226_v42 = vmax.f32 %v224_v40, 0.0 }
  0xae   :  { %v227_v43 = vmax.f32 %v225_v41, 0.0 }
  0xaf   :  { %314 = vmatmul.f32.vlgmr.msra.gmra.mxu0 %v226_v42  ;;  %354 = vmatmul.f32.vlgmr.msra.gmra.mxu2 %v226_v42 }
  0xb0   :  { %334 = vmatmul.f32.vlgmr.msra.gmra.mxu1 %v227_v43  ;;  %374 = vmatmul.f32.vlgmr.msra.gmra.mxu3 %v227_v43 }
 0x12c   :  { %v315_v57 = vpop.f32.mrf.mxu0 }
 0x12d   :  { %v316_v58 = vadd.f32 %v315_v57, %v294_v56  ;;  %v335_v59 = vpop.f32.mrf.mxu1 }
 0x12f   :  { %v336_v60 = vadd.f32 %v335_v59, %v316_v58 }
 0x131   :  { %v378_v62 = vmax.f32 %v336_v60, 0.0 }
 0x132   :  { %v355_v63 = vpop.f32.mrf.mxu2 }
 0x133   :  { %432 = vmatmul.f32.vlgmr.msrb.gmra.mxu0 %v378_v62  ;;  %v356_v0 = vadd.f32 %v355_v63, %v295_v61  ;;  %v375_v1 = vpop.f32.mrf.mxu3 }
 0x135   :  { %v376_v2 = vadd.f32 %v375_v1, %v356_v0 }
 0x137   :  { %v379_v3 = vmax.f32 %v376_v2, 0.0 }
 0x139   :  { %452 = vmatmul.f32.vlgmr.msrb.gmra.mxu1 %v379_v3 }
 0x1b0   :  { %v433_v5 = vpop.f32.mrf.mxu0 }
 0x1b1   :  { %v434_v6 = vadd.f32 %v479_v4, %v433_v5 }
 0x1b6   :  { %v453_v7 = vpop.f32.mrf.mxu1 }
 0x1b7   :  { %v454_v8 = vadd.f32 %v453_v7, %v434_v6 }
 0x1b9   :  { %456 = vst [vmem:[%s731_s9] sm:$0xff] %v454_v8 }
 0x1ba   :  { %461 = vsyncpa [#allocation3], 1 }
 0x1bb   :  { %462 = vsyncpa [#allocation5], 1 }
 0x1bc   :  { %463 = vsyncpa [#allocation8], 1 }
 0x1bd   :  { %464 = vsyncpa [#allocation11], 1 }

</bundles_post_ra>
